<compile_context>
chip_gen: v6e
topology: v6e:2x2x1
jax: 0.10.0
libtpu: 0.0.40
codegen_flags: <defaults>
</compile_context>

<pallas_src>
import functools

import numpy as np
import jax
import jax.numpy as jnp
from jax import lax
from jax.experimental import pallas as pl
from jax.experimental.pallas import tpu as pltpu


def _qnn_kernel(x_ref, w_ref, o_ref, *, n_qubits, n_layers):
    """One out-feature's circuits over a lane-dense tile of the batch.

    x_ref: (n_qubits, tb)        encoding angles for tb circuits (x^T tile)
    w_ref: (1, n_qubits, n_layers) variational angles for this out_feature
    o_ref: (1, 1, tb)            <Z_0> expectation per circuit
    """
    D = 1 << n_qubits
    tb = x_ref.shape[1]
    f32 = jnp.float32

    # ---- per-qubit constants: computed ONCE, reused by the unrolled loops ----
    sub = lax.broadcasted_iota(jnp.int32, (D, 1), 0)          # sublane index k
    bit = [(sub >> q) & 1 for q in range(n_qubits)]           # bit q of k
    is_one = [b == 1 for b in bit]                            # (D, 1) bool
    if n_qubits > 1:
        cz = [jnp.where((bit[q] & bit[q + 1]) == 1, -1.0, 1.0).astype(f32)
              for q in range(n_qubits - 1)]
        cz_layer = functools.reduce(lambda a, b: a * b, cz)   # whole CZ chain
    else:
        cz_layer = None
    z0 = jnp.where(is_one[0], -1.0, 1.0).astype(f32)          # <Z_0> eigenvalues

    # ---- half-angle trig, in-kernel (EUP) ----
    enc = 0.5 * x_ref[...]                                    # (n, tb)
    enc_cos = jnp.cos(enc)
    enc_sin = jnp.sin(enc)
    var = 0.5 * w_ref[0]                                      # (n, L)
    var_cos = jnp.cos(var)
    var_sin = jnp.sin(var)

    def signed_partner(state, q):
        # partner[k] = state[k XOR 2**q], with the RY sign folded in:
        #   bit q == 1 rows need +state[k - 2**q]
        #   bit q == 0 rows need -state[k + 2**q]
        # The select never picks a wrapped row, so the rotation is safe.
        s = 1 << q
        down = pltpu.roll(state, s, axis=0)        # [k] <- state[k - s]
        up = pltpu.roll(state, D - s, axis=0)      # [k] <- state[k + s]
        return jnp.where(is_one[q], down, -up)

    def apply_ry(state, q, c, s):
        # RY(theta):  a0' = c*a0 - s*a1 ; a1' = s*a0 + c*a1
        return c * state + s * signed_partner(state, q)

    # H on every qubit applied to |0...0> is the uniform superposition; start
    # directly from it (exact algebraic simplification of the H layer).
    state = jnp.full((D, tb), 2.0 ** (-0.5 * n_qubits), f32)

    # ---- encoding layer: RY(x_q) on every qubit ----
    for q in range(n_qubits):
        state = apply_ry(state, q, enc_cos[q:q + 1, :], enc_sin[q:q + 1, :])

    # ---- variational layers: RY(theta_{q,l}) per qubit, then CZ chain ----
    for l in range(n_layers):
        for q in range(n_qubits):
            c = var_cos[q:q + 1, l:l + 1]          # (1, 1), broadcast in mul
            s = var_sin[q:q + 1, l:l + 1]
            state = apply_ry(state, q, c, s)
        if cz_layer is not None:
            state = state * cz_layer

    # ---- expectation <Z_0> (qubit 0 = least-significant bit) ----
    exp = jnp.sum(state * state * z0, axis=0, keepdims=True)  # (1, tb)
    o_ref[...] = exp.reshape(o_ref.shape).astype(o_ref.dtype)


def qnn_forward(x, weight, *, max_batch_tile=512):
    """Pallas implementation of QNN.forward.

    x:      (n_batch, in_features) float32
    weight: (out_features, in_features, variational_layers) float32
    returns (out_features, n_batch) float32
    """
    n_batch, n = x.shape
    out_features, n2, n_layers = weight.shape
    assert n2 == n

    x_t = jnp.asarray(x, jnp.float32).T                     # (n, n_batch)
    w = jnp.asarray(weight, jnp.float32)                    # (O, n, L)

    # Batch tile: lane-dense (multiple of 128), capped at max_batch_tile.
    lane = 128
    if n_batch >= max_batch_tile:
        tb = max_batch_tile                                  # multiple of 128
    else:
        tb = ((n_batch + lane - 1) // lane) * lane
    nb_pad = ((n_batch + tb - 1) // tb) * tb
    if nb_pad != n_batch:
        x_t = jnp.pad(x_t, ((0, 0), (0, nb_pad - n_batch)))

    grid = (out_features, nb_pad // tb)
    kernel = functools.partial(_qnn_kernel, n_qubits=n, n_layers=n_layers)

    out3 = pl.pallas_call(
        kernel,
        out_shape=jax.ShapeDtypeStruct((out_features, 1, nb_pad), jnp.float32),
        grid_spec=pltpu.PrefetchScalarGridSpec(
            num_scalar_prefetch=0,
            grid=grid,
            in_specs=[
                # x^T tile: re-read (broadcast) for every out_feature.
                pl.BlockSpec((n, tb), lambda o, b: (0, b)),
                # weight row of this out_feature: broadcast over batch tiles.
                pl.BlockSpec((1, n, n_layers), lambda o, b: (o, 0, 0)),
            ],
            out_specs=pl.BlockSpec((1, 1, tb), lambda o, b: (o, 0, b)),
        ),
        compiler_params=pltpu.CompilerParams(
            dimension_semantics=("parallel", "parallel")),
    )(x_t, w)

    return out3.reshape(out_features, nb_pad)[:, :n_batch]


def _reference_forward(x, weight):
    """Pure-numpy state-vector reference of the same circuit (for checking)."""
    x = np.asarray(x, np.float64)
    w = np.asarray(weight, np.float64)
    B, n = x.shape
    O, _, L = w.shape
    D = 1 << n
    out = np.zeros((O, B), np.float32)

    def ry(state, q, th):
        c, s = np.cos(th / 2), np.sin(th / 2)
        new = state.copy()
        for k in range(D):
            if ((k >> q) & 1) == 0:
                k1 = k | (1 << q)
                a0, a1 = state[k], state[k1]
                new[k] = c * a0 - s * a1
                new[k1] = s * a0 + c * a1
        return new

    def h(state, q):
        new = state.copy()
        for k in range(D):
            if ((k >> q) & 1) == 0:
                k1 = k | (1 << q)
                a0, a1 = state[k], state[k1]
                new[k] = (a0 + a1) / np.sqrt(2.0)
                new[k1] = (a0 - a1) / np.sqrt(2.0)
        return new

    def cz(state, qa, qb):
        new = state.copy()
        for k in range(D):
            if ((k >> qa) & 1) and ((k >> qb) & 1):
                new[k] = -new[k]
        return new

    z0 = np.where((np.arange(D) & 1) == 0, 1.0, -1.0)
    for o in range(O):
        for b in range(B):
            state = np.zeros(D)
            state[0] = 1.0
            for q in range(n):
                state = h(state, q)
            for q in range(n):
                state = ry(state, q, x[b, q])
            for l in range(L):
                for q in range(n):
                    state = ry(state, q, w[o, q, l])
                for q in range(n - 1):
                    state = cz(state, q, q + 1)
            out[o, b] = np.sum(state * state * z0)
    return out


if __name__ == "__main__":
    in_features = 4          # n_qubits
    out_features = 4
    variational_layers = 2
    n_batch = 8

    key = jax.random.PRNGKey(0)
    kx, kw = jax.random.split(key)
    x = jax.random.normal(kx, (n_batch, in_features), dtype=jnp.float32)
    # deterministic stand-in for torch.randn(out, in, layers) weights
    weight = jax.random.normal(
        kw, (out_features, in_features, variational_layers), dtype=jnp.float32)

    out = qnn_forward(x, weight)
    out = jax.block_until_ready(out)

    assert out.shape == (out_features, n_batch), out.shape
    assert out.dtype == jnp.float32, out.dtype

    ref = _reference_forward(np.asarray(x), np.asarray(weight))
    np.testing.assert_allclose(np.asarray(out), ref, atol=1e-4, rtol=1e-4)

    print("KERNEL_OK")
</pallas_src>

<mosaic_0001>
module attributes {stable_mosaic.version = 11 : i64} {
  func.func @_qnn_kernel(%arg0: i32, %arg1: i32, %arg2: memref<4x128xf32, #tpu.memory_space<vmem>>, %arg3: memref<1x4x2xf32, #tpu.memory_space<vmem>>, %arg4: memref<1x1x128xf32, #tpu.memory_space<vmem>>) attributes {dimension_semantics = [#tpu.dimension_semantics<parallel>, #tpu.dimension_semantics<parallel>], iteration_bounds = array<i64: 4, 1>, scalar_prefetch = 0 : i64, scratch_operands = 0 : i64, tpu.core_type = #tpu.core_type<tc>, window_params = [{transform_indices = @transform_0, window_bounds = array<i64: 4, 128>}, {transform_indices = @transform_1, window_bounds = array<i64: 1, 4, 2>}, {transform_indices = @transform_2, window_bounds = array<i64: 1, 1, 128>}]} {
    %0 = tpu.iota {dimensions = array<i32: 0>} : vector<16x1xi32>
    %c0_i32 = arith.constant 0 : i32
    %1 = vector.broadcast %c0_i32 : i32 to vector<16x1xi32>
    %2 = arith.shrsi %0, %1 : vector<16x1xi32>
    %c1_i32 = arith.constant 1 : i32
    %3 = vector.broadcast %c1_i32 : i32 to vector<16x1xi32>
    %4 = arith.andi %2, %3 : vector<16x1xi32>
    %c1_i32_0 = arith.constant 1 : i32
    %5 = vector.broadcast %c1_i32_0 : i32 to vector<16x1xi32>
    %6 = arith.shrsi %0, %5 : vector<16x1xi32>
    %c1_i32_1 = arith.constant 1 : i32
    %7 = vector.broadcast %c1_i32_1 : i32 to vector<16x1xi32>
    %8 = arith.andi %6, %7 : vector<16x1xi32>
    %c2_i32 = arith.constant 2 : i32
    %9 = vector.broadcast %c2_i32 : i32 to vector<16x1xi32>
    %10 = arith.shrsi %0, %9 : vector<16x1xi32>
    %c1_i32_2 = arith.constant 1 : i32
    %11 = vector.broadcast %c1_i32_2 : i32 to vector<16x1xi32>
    %12 = arith.andi %10, %11 : vector<16x1xi32>
    %c3_i32 = arith.constant 3 : i32
    %13 = vector.broadcast %c3_i32 : i32 to vector<16x1xi32>
    %14 = arith.shrsi %0, %13 : vector<16x1xi32>
    %c1_i32_3 = arith.constant 1 : i32
    %15 = vector.broadcast %c1_i32_3 : i32 to vector<16x1xi32>
    %16 = arith.andi %14, %15 : vector<16x1xi32>
    %c1_i32_4 = arith.constant 1 : i32
    %17 = vector.broadcast %c1_i32_4 : i32 to vector<16x1xi32>
    %18 = arith.cmpi eq, %4, %17 : vector<16x1xi32>
    %c1_i32_5 = arith.constant 1 : i32
    %19 = vector.broadcast %c1_i32_5 : i32 to vector<16x1xi32>
    %20 = arith.cmpi eq, %8, %19 : vector<16x1xi32>
    %c1_i32_6 = arith.constant 1 : i32
    %21 = vector.broadcast %c1_i32_6 : i32 to vector<16x1xi32>
    %22 = arith.cmpi eq, %12, %21 : vector<16x1xi32>
    %c1_i32_7 = arith.constant 1 : i32
    %23 = vector.broadcast %c1_i32_7 : i32 to vector<16x1xi32>
    %24 = arith.cmpi eq, %16, %23 : vector<16x1xi32>
    %25 = arith.andi %4, %8 : vector<16x1xi32>
    %c1_i32_8 = arith.constant 1 : i32
    %26 = vector.broadcast %c1_i32_8 : i32 to vector<16x1xi32>
    %27 = arith.cmpi eq, %25, %26 : vector<16x1xi32>
    %cst = arith.constant -1.000000e+00 : f32
    %cst_9 = arith.constant 1.000000e+00 : f32
    %28 = vector.broadcast %cst : f32 to vector<16x1xf32>
    %29 = vector.broadcast %cst_9 : f32 to vector<16x1xf32>
    %30 = arith.select %27, %28, %29 : vector<16x1xi1>, vector<16x1xf32>
    %31 = arith.andi %8, %12 : vector<16x1xi32>
    %c1_i32_10 = arith.constant 1 : i32
    %32 = vector.broadcast %c1_i32_10 : i32 to vector<16x1xi32>
    %33 = arith.cmpi eq, %31, %32 : vector<16x1xi32>
    %cst_11 = arith.constant -1.000000e+00 : f32
    %cst_12 = arith.constant 1.000000e+00 : f32
    %34 = vector.broadcast %cst_11 : f32 to vector<16x1xf32>
    %35 = vector.broadcast %cst_12 : f32 to vector<16x1xf32>
    %36 = arith.select %33, %34, %35 : vector<16x1xi1>, vector<16x1xf32>
    %37 = arith.andi %12, %16 : vector<16x1xi32>
    %c1_i32_13 = arith.constant 1 : i32
    %38 = vector.broadcast %c1_i32_13 : i32 to vector<16x1xi32>
    %39 = arith.cmpi eq, %37, %38 : vector<16x1xi32>
    %cst_14 = arith.constant -1.000000e+00 : f32
    %cst_15 = arith.constant 1.000000e+00 : f32
    %40 = vector.broadcast %cst_14 : f32 to vector<16x1xf32>
    %41 = vector.broadcast %cst_15 : f32 to vector<16x1xf32>
    %42 = arith.select %39, %40, %41 : vector<16x1xi1>, vector<16x1xf32>
    %43 = arith.mulf %30, %36 : vector<16x1xf32>
    %44 = arith.mulf %43, %42 : vector<16x1xf32>
    %cst_16 = arith.constant -1.000000e+00 : f32
    %cst_17 = arith.constant 1.000000e+00 : f32
    %45 = vector.broadcast %cst_16 : f32 to vector<16x1xf32>
    %46 = vector.broadcast %cst_17 : f32 to vector<16x1xf32>
    %47 = arith.select %18, %45, %46 : vector<16x1xi1>, vector<16x1xf32>
    %c0 = arith.constant 0 : index
    %c0_18 = arith.constant 0 : index
    %48 = vector.load %arg2[%c0, %c0_18] : memref<4x128xf32, #tpu.memory_space<vmem>>, vector<4x128xf32>
    %cst_19 = arith.constant 5.000000e-01 : f32
    %49 = vector.broadcast %cst_19 : f32 to vector<4x128xf32>
    %50 = arith.mulf %49, %48 : vector<4x128xf32>
    %51 = math.cos %50 : vector<4x128xf32>
    %52 = math.sin %50 : vector<4x128xf32>
    %c0_20 = arith.constant 0 : index
    %c0_21 = arith.constant 0 : index
    %c0_22 = arith.constant 0 : index
    %53 = vector.load %arg3[%c0_20, %c0_21, %c0_22] : memref<1x4x2xf32, #tpu.memory_space<vmem>>, vector<1x4x2xf32>
    %54 = vector.shape_cast %53 : vector<1x4x2xf32> to vector<4x2xf32>
    %cst_23 = arith.constant 5.000000e-01 : f32
    %55 = vector.broadcast %cst_23 : f32 to vector<4x2xf32>
    %56 = arith.mulf %55, %54 : vector<4x2xf32>
    %57 = math.cos %56 : vector<4x2xf32>
    %58 = math.sin %56 : vector<4x2xf32>
    %cst_24 = arith.constant 2.500000e-01 : f32
    %59 = vector.broadcast %cst_24 : f32 to vector<16x128xf32>
    %60 = vector.extract_strided_slice %51 {offsets = [0, 0], sizes = [1, 128], strides = [1, 1]} : vector<4x128xf32> to vector<1x128xf32>
    %61 = vector.extract_strided_slice %52 {offsets = [0, 0], sizes = [1, 128], strides = [1, 1]} : vector<4x128xf32> to vector<1x128xf32>
    %62 = vector.broadcast %60 : vector<1x128xf32> to vector<16x128xf32>
    %63 = arith.mulf %62, %59 : vector<16x128xf32>
    %c1_i32_25 = arith.constant 1 : i32
    %64 = tpu.dynamic_rotate %59 by %c1_i32_25 dim 0 : vector<16x128xf32>, i32 -> vector<16x128xf32>
    %c15_i32 = arith.constant 15 : i32
    %65 = tpu.dynamic_rotate %59 by %c15_i32 dim 0 : vector<16x128xf32>, i32 -> vector<16x128xf32>
    %cst_26 = arith.constant 0.000000e+00 : f32
    %66 = vector.broadcast %cst_26 : f32 to vector<16x128xf32>
    %67 = arith.subf %66, %65 : vector<16x128xf32>
    %68 = vector.shape_cast %18 : vector<16x1xi1> to vector<16x1xi1>
    %69 = vector.broadcast %68 : vector<16x1xi1> to vector<16x128xi1>
    %70 = arith.select %69, %64, %67 : vector<16x128xi1>, vector<16x128xf32>
    %71 = vector.broadcast %61 : vector<1x128xf32> to vector<16x128xf32>
    %72 = arith.mulf %71, %70 : vector<16x128xf32>
    %73 = arith.addf %63, %72 : vector<16x128xf32>
    %74 = vector.extract_strided_slice %51 {offsets = [1, 0], sizes = [1, 128], strides = [1, 1]} : vector<4x128xf32> to vector<1x128xf32>
    %75 = vector.extract_strided_slice %52 {offsets = [1, 0], sizes = [1, 128], strides = [1, 1]} : vector<4x128xf32> to vector<1x128xf32>
    %76 = vector.broadcast %74 : vector<1x128xf32> to vector<16x128xf32>
    %77 = arith.mulf %76, %73 : vector<16x128xf32>
    %c2_i32_27 = arith.constant 2 : i32
    %78 = tpu.dynamic_rotate %73 by %c2_i32_27 dim 0 : vector<16x128xf32>, i32 -> vector<16x128xf32>
    %c14_i32 = arith.constant 14 : i32
    %79 = tpu.dynamic_rotate %73 by %c14_i32 dim 0 : vector<16x128xf32>, i32 -> vector<16x128xf32>
    %cst_28 = arith.constant 0.000000e+00 : f32
    %80 = vector.broadcast %cst_28 : f32 to vector<16x128xf32>
    %81 = arith.subf %80, %79 : vector<16x128xf32>
    %82 = vector.shape_cast %20 : vector<16x1xi1> to vector<16x1xi1>
    %83 = vector.broadcast %82 : vector<16x1xi1> to vector<16x128xi1>
    %84 = arith.select %83, %78, %81 : vector<16x128xi1>, vector<16x128xf32>
    %85 = vector.broadcast %75 : vector<1x128xf32> to vector<16x128xf32>
    %86 = arith.mulf %85, %84 : vector<16x128xf32>
    %87 = arith.addf %77, %86 : vector<16x128xf32>
    %88 = vector.extract_strided_slice %51 {offsets = [2, 0], sizes = [1, 128], strides = [1, 1]} : vector<4x128xf32> to vector<1x128xf32>
    %89 = vector.extract_strided_slice %52 {offsets = [2, 0], sizes = [1, 128], strides = [1, 1]} : vector<4x128xf32> to vector<1x128xf32>
    %90 = vector.broadcast %88 : vector<1x128xf32> to vector<16x128xf32>
    %91 = arith.mulf %90, %87 : vector<16x128xf32>
    %c4_i32 = arith.constant 4 : i32
    %92 = tpu.dynamic_rotate %87 by %c4_i32 dim 0 : vector<16x128xf32>, i32 -> vector<16x128xf32>
    %c12_i32 = arith.constant 12 : i32
    %93 = tpu.dynamic_rotate %87 by %c12_i32 dim 0 : vector<16x128xf32>, i32 -> vector<16x128xf32>
    %cst_29 = arith.constant 0.000000e+00 : f32
    %94 = vector.broadcast %cst_29 : f32 to vector<16x128xf32>
    %95 = arith.subf %94, %93 : vector<16x128xf32>
    %96 = vector.shape_cast %22 : vector<16x1xi1> to vector<16x1xi1>
    %97 = vector.broadcast %96 : vector<16x1xi1> to vector<16x128xi1>
    %98 = arith.select %97, %92, %95 : vector<16x128xi1>, vector<16x128xf32>
    %99 = vector.broadcast %89 : vector<1x128xf32> to vector<16x128xf32>
    %100 = arith.mulf %99, %98 : vector<16x128xf32>
    %101 = arith.addf %91, %100 : vector<16x128xf32>
    %102 = vector.extract_strided_slice %51 {offsets = [3, 0], sizes = [1, 128], strides = [1, 1]} : vector<4x128xf32> to vector<1x128xf32>
    %103 = vector.extract_strided_slice %52 {offsets = [3, 0], sizes = [1, 128], strides = [1, 1]} : vector<4x128xf32> to vector<1x128xf32>
    %104 = vector.broadcast %102 : vector<1x128xf32> to vector<16x128xf32>
    %105 = arith.mulf %104, %101 : vector<16x128xf32>
    %c8_i32 = arith.constant 8 : i32
    %106 = tpu.dynamic_rotate %101 by %c8_i32 dim 0 : vector<16x128xf32>, i32 -> vector<16x128xf32>
    %c8_i32_30 = arith.constant 8 : i32
    %107 = tpu.dynamic_rotate %101 by %c8_i32_30 dim 0 : vector<16x128xf32>, i32 -> vector<16x128xf32>
    %cst_31 = arith.constant 0.000000e+00 : f32
    %108 = vector.broadcast %cst_31 : f32 to vector<16x128xf32>
    %109 = arith.subf %108, %107 : vector<16x128xf32>
    %110 = vector.shape_cast %24 : vector<16x1xi1> to vector<16x1xi1>
    %111 = vector.broadcast %110 : vector<16x1xi1> to vector<16x128xi1>
    %112 = arith.select %111, %106, %109 : vector<16x128xi1>, vector<16x128xf32>
    %113 = vector.broadcast %103 : vector<1x128xf32> to vector<16x128xf32>
    %114 = arith.mulf %113, %112 : vector<16x128xf32>
    %115 = arith.addf %105, %114 : vector<16x128xf32>
    %116 = vector.extract_strided_slice %57 {offsets = [0, 0], sizes = [1, 1], strides = [1, 1]} : vector<4x2xf32> to vector<1x1xf32>
    %117 = vector.extract_strided_slice %58 {offsets = [0, 0], sizes = [1, 1], strides = [1, 1]} : vector<4x2xf32> to vector<1x1xf32>
    %118 = vector.broadcast %116 : vector<1x1xf32> to vector<16x128xf32>
    %119 = arith.mulf %118, %115 : vector<16x128xf32>
    %c1_i32_32 = arith.constant 1 : i32
    %120 = tpu.dynamic_rotate %115 by %c1_i32_32 dim 0 : vector<16x128xf32>, i32 -> vector<16x128xf32>
    %c15_i32_33 = arith.constant 15 : i32
    %121 = tpu.dynamic_rotate %115 by %c15_i32_33 dim 0 : vector<16x128xf32>, i32 -> vector<16x128xf32>
    %cst_34 = arith.constant 0.000000e+00 : f32
    %122 = vector.broadcast %cst_34 : f32 to vector<16x128xf32>
    %123 = arith.subf %122, %121 : vector<16x128xf32>
    %124 = vector.shape_cast %18 : vector<16x1xi1> to vector<16x1xi1>
    %125 = vector.broadcast %124 : vector<16x1xi1> to vector<16x128xi1>
    %126 = arith.select %125, %120, %123 : vector<16x128xi1>, vector<16x128xf32>
    %127 = vector.broadcast %117 : vector<1x1xf32> to vector<16x128xf32>
    %128 = arith.mulf %127, %126 : vector<16x128xf32>
    %129 = arith.addf %119, %128 : vector<16x128xf32>
    %130 = vector.extract_strided_slice %57 {offsets = [1, 0], sizes = [1, 1], strides = [1, 1]} : vector<4x2xf32> to vector<1x1xf32>
    %131 = vector.extract_strided_slice %58 {offsets = [1, 0], sizes = [1, 1], strides = [1, 1]} : vector<4x2xf32> to vector<1x1xf32>
    %132 = vector.broadcast %130 : vector<1x1xf32> to vector<16x128xf32>
    %133 = arith.mulf %132, %129 : vector<16x128xf32>
    %c2_i32_35 = arith.constant 2 : i32
    %134 = tpu.dynamic_rotate %129 by %c2_i32_35 dim 0 : vector<16x128xf32>, i32 -> vector<16x128xf32>
    %c14_i32_36 = arith.constant 14 : i32
    %135 = tpu.dynamic_rotate %129 by %c14_i32_36 dim 0 : vector<16x128xf32>, i32 -> vector<16x128xf32>
    %cst_37 = arith.constant 0.000000e+00 : f32
    %136 = vector.broadcast %cst_37 : f32 to vector<16x128xf32>
    %137 = arith.subf %136, %135 : vector<16x128xf32>
    %138 = vector.shape_cast %20 : vector<16x1xi1> to vector<16x1xi1>
    %139 = vector.broadcast %138 : vector<16x1xi1> to vector<16x128xi1>
    %140 = arith.select %139, %134, %137 : vector<16x128xi1>, vector<16x128xf32>
    %141 = vector.broadcast %131 : vector<1x1xf32> to vector<16x128xf32>
    %142 = arith.mulf %141, %140 : vector<16x128xf32>
    %143 = arith.addf %133, %142 : vector<16x128xf32>
    %144 = vector.extract_strided_slice %57 {offsets = [2, 0], sizes = [1, 1], strides = [1, 1]} : vector<4x2xf32> to vector<1x1xf32>
    %145 = vector.extract_strided_slice %58 {offsets = [2, 0], sizes = [1, 1], strides = [1, 1]} : vector<4x2xf32> to vector<1x1xf32>
    %146 = vector.broadcast %144 : vector<1x1xf32> to vector<16x128xf32>
    %147 = arith.mulf %146, %143 : vector<16x128xf32>
    %c4_i32_38 = arith.constant 4 : i32
    %148 = tpu.dynamic_rotate %143 by %c4_i32_38 dim 0 : vector<16x128xf32>, i32 -> vector<16x128xf32>
    %c12_i32_39 = arith.constant 12 : i32
    %149 = tpu.dynamic_rotate %143 by %c12_i32_39 dim 0 : vector<16x128xf32>, i32 -> vector<16x128xf32>
    %cst_40 = arith.constant 0.000000e+00 : f32
    %150 = vector.broadcast %cst_40 : f32 to vector<16x128xf32>
    %151 = arith.subf %150, %149 : vector<16x128xf32>
    %152 = vector.shape_cast %22 : vector<16x1xi1> to vector<16x1xi1>
    %153 = vector.broadcast %152 : vector<16x1xi1> to vector<16x128xi1>
    %154 = arith.select %153, %148, %151 : vector<16x128xi1>, vector<16x128xf32>
    %155 = vector.broadcast %145 : vector<1x1xf32> to vector<16x128xf32>
    %156 = arith.mulf %155, %154 : vector<16x128xf32>
    %157 = arith.addf %147, %156 : vector<16x128xf32>
    %158 = vector.extract_strided_slice %57 {offsets = [3, 0], sizes = [1, 1], strides = [1, 1]} : vector<4x2xf32> to vector<1x1xf32>
    %159 = vector.extract_strided_slice %58 {offsets = [3, 0], sizes = [1, 1], strides = [1, 1]} : vector<4x2xf32> to vector<1x1xf32>
    %160 = vector.broadcast %158 : vector<1x1xf32> to vector<16x128xf32>
    %161 = arith.mulf %160, %157 : vector<16x128xf32>
    %c8_i32_41 = arith.constant 8 : i32
    %162 = tpu.dynamic_rotate %157 by %c8_i32_41 dim 0 : vector<16x128xf32>, i32 -> vector<16x128xf32>
    %c8_i32_42 = arith.constant 8 : i32
    %163 = tpu.dynamic_rotate %157 by %c8_i32_42 dim 0 : vector<16x128xf32>, i32 -> vector<16x128xf32>
    %cst_43 = arith.constant 0.000000e+00 : f32
    %164 = vector.broadcast %cst_43 : f32 to vector<16x128xf32>
    %165 = arith.subf %164, %163 : vector<16x128xf32>
    %166 = vector.shape_cast %24 : vector<16x1xi1> to vector<16x1xi1>
    %167 = vector.broadcast %166 : vector<16x1xi1> to vector<16x128xi1>
    %168 = arith.select %167, %162, %165 : vector<16x128xi1>, vector<16x128xf32>
    %169 = vector.broadcast %159 : vector<1x1xf32> to vector<16x128xf32>
    %170 = arith.mulf %169, %168 : vector<16x128xf32>
    %171 = arith.addf %161, %170 : vector<16x128xf32>
    %172 = vector.broadcast %44 : vector<16x1xf32> to vector<16x128xf32>
    %173 = arith.mulf %171, %172 : vector<16x128xf32>
    %174 = vector.extract_strided_slice %57 {offsets = [0, 1], sizes = [1, 1], strides = [1, 1]} : vector<4x2xf32> to vector<1x1xf32>
    %175 = vector.extract_strided_slice %58 {offsets = [0, 1], sizes = [1, 1], strides = [1, 1]} : vector<4x2xf32> to vector<1x1xf32>
    %176 = vector.broadcast %174 : vector<1x1xf32> to vector<16x128xf32>
    %177 = arith.mulf %176, %173 : vector<16x128xf32>
    %c1_i32_44 = arith.constant 1 : i32
    %178 = tpu.dynamic_rotate %173 by %c1_i32_44 dim 0 : vector<16x128xf32>, i32 -> vector<16x128xf32>
    %c15_i32_45 = arith.constant 15 : i32
    %179 = tpu.dynamic_rotate %173 by %c15_i32_45 dim 0 : vector<16x128xf32>, i32 -> vector<16x128xf32>
    %cst_46 = arith.constant 0.000000e+00 : f32
    %180 = vector.broadcast %cst_46 : f32 to vector<16x128xf32>
    %181 = arith.subf %180, %179 : vector<16x128xf32>
    %182 = vector.shape_cast %18 : vector<16x1xi1> to vector<16x1xi1>
    %183 = vector.broadcast %182 : vector<16x1xi1> to vector<16x128xi1>
    %184 = arith.select %183, %178, %181 : vector<16x128xi1>, vector<16x128xf32>
    %185 = vector.broadcast %175 : vector<1x1xf32> to vector<16x128xf32>
    %186 = arith.mulf %185, %184 : vector<16x128xf32>
    %187 = arith.addf %177, %186 : vector<16x128xf32>
    %188 = vector.extract_strided_slice %57 {offsets = [1, 1], sizes = [1, 1], strides = [1, 1]} : vector<4x2xf32> to vector<1x1xf32>
    %189 = vector.extract_strided_slice %58 {offsets = [1, 1], sizes = [1, 1], strides = [1, 1]} : vector<4x2xf32> to vector<1x1xf32>
    %190 = vector.broadcast %188 : vector<1x1xf32> to vector<16x128xf32>
    %191 = arith.mulf %190, %187 : vector<16x128xf32>
    %c2_i32_47 = arith.constant 2 : i32
    %192 = tpu.dynamic_rotate %187 by %c2_i32_47 dim 0 : vector<16x128xf32>, i32 -> vector<16x128xf32>
    %c14_i32_48 = arith.constant 14 : i32
    %193 = tpu.dynamic_rotate %187 by %c14_i32_48 dim 0 : vector<16x128xf32>, i32 -> vector<16x128xf32>
    %cst_49 = arith.constant 0.000000e+00 : f32
    %194 = vector.broadcast %cst_49 : f32 to vector<16x128xf32>
    %195 = arith.subf %194, %193 : vector<16x128xf32>
    %196 = vector.shape_cast %20 : vector<16x1xi1> to vector<16x1xi1>
    %197 = vector.broadcast %196 : vector<16x1xi1> to vector<16x128xi1>
    %198 = arith.select %197, %192, %195 : vector<16x128xi1>, vector<16x128xf32>
    %199 = vector.broadcast %189 : vector<1x1xf32> to vector<16x128xf32>
    %200 = arith.mulf %199, %198 : vector<16x128xf32>
    %201 = arith.addf %191, %200 : vector<16x128xf32>
    %202 = vector.extract_strided_slice %57 {offsets = [2, 1], sizes = [1, 1], strides = [1, 1]} : vector<4x2xf32> to vector<1x1xf32>
    %203 = vector.extract_strided_slice %58 {offsets = [2, 1], sizes = [1, 1], strides = [1, 1]} : vector<4x2xf32> to vector<1x1xf32>
    %204 = vector.broadcast %202 : vector<1x1xf32> to vector<16x128xf32>
    %205 = arith.mulf %204, %201 : vector<16x128xf32>
    %c4_i32_50 = arith.constant 4 : i32
    %206 = tpu.dynamic_rotate %201 by %c4_i32_50 dim 0 : vector<16x128xf32>, i32 -> vector<16x128xf32>
    %c12_i32_51 = arith.constant 12 : i32
    %207 = tpu.dynamic_rotate %201 by %c12_i32_51 dim 0 : vector<16x128xf32>, i32 -> vector<16x128xf32>
    %cst_52 = arith.constant 0.000000e+00 : f32
    %208 = vector.broadcast %cst_52 : f32 to vector<16x128xf32>
    %209 = arith.subf %208, %207 : vector<16x128xf32>
    %210 = vector.shape_cast %22 : vector<16x1xi1> to vector<16x1xi1>
    %211 = vector.broadcast %210 : vector<16x1xi1> to vector<16x128xi1>
    %212 = arith.select %211, %206, %209 : vector<16x128xi1>, vector<16x128xf32>
    %213 = vector.broadcast %203 : vector<1x1xf32> to vector<16x128xf32>
    %214 = arith.mulf %213, %212 : vector<16x128xf32>
    %215 = arith.addf %205, %214 : vector<16x128xf32>
    %216 = vector.extract_strided_slice %57 {offsets = [3, 1], sizes = [1, 1], strides = [1, 1]} : vector<4x2xf32> to vector<1x1xf32>
    %217 = vector.extract_strided_slice %58 {offsets = [3, 1], sizes = [1, 1], strides = [1, 1]} : vector<4x2xf32> to vector<1x1xf32>
    %218 = vector.broadcast %216 : vector<1x1xf32> to vector<16x128xf32>
    %219 = arith.mulf %218, %215 : vector<16x128xf32>
    %c8_i32_53 = arith.constant 8 : i32
    %220 = tpu.dynamic_rotate %215 by %c8_i32_53 dim 0 : vector<16x128xf32>, i32 -> vector<16x128xf32>
    %c8_i32_54 = arith.constant 8 : i32
    %221 = tpu.dynamic_rotate %215 by %c8_i32_54 dim 0 : vector<16x128xf32>, i32 -> vector<16x128xf32>
    %cst_55 = arith.constant 0.000000e+00 : f32
    %222 = vector.broadcast %cst_55 : f32 to vector<16x128xf32>
    %223 = arith.subf %222, %221 : vector<16x128xf32>
    %224 = vector.shape_cast %24 : vector<16x1xi1> to vector<16x1xi1>
    %225 = vector.broadcast %224 : vector<16x1xi1> to vector<16x128xi1>
    %226 = arith.select %225, %220, %223 : vector<16x128xi1>, vector<16x128xf32>
    %227 = vector.broadcast %217 : vector<1x1xf32> to vector<16x128xf32>
    %228 = arith.mulf %227, %226 : vector<16x128xf32>
    %229 = arith.addf %219, %228 : vector<16x128xf32>
    %230 = vector.broadcast %44 : vector<16x1xf32> to vector<16x128xf32>
    %231 = arith.mulf %229, %230 : vector<16x128xf32>
    %232 = arith.mulf %231, %231 : vector<16x128xf32>
    %233 = vector.broadcast %47 : vector<16x1xf32> to vector<16x128xf32>
    %234 = arith.mulf %232, %233 : vector<16x128xf32>
    %cst_56 = arith.constant dense<0.000000e+00> : vector<128xf32>
    %235 = vector.multi_reduction <add>, %234, %cst_56 [0] : vector<16x128xf32> to vector<128xf32>
    %236 = vector.shape_cast %235 : vector<128xf32> to vector<1x128xf32>
    %237 = vector.shape_cast %236 : vector<1x128xf32> to vector<1x1x128xf32>
    %c0_57 = arith.constant 0 : index
    %c0_58 = arith.constant 0 : index
    %c0_59 = arith.constant 0 : index
    %238 = vector.load %arg4[%c0_57, %c0_58, %c0_59] : memref<1x1x128xf32, #tpu.memory_space<vmem>>, vector<1x1x128xf32>
    tpu.vector_store %arg4[%c0_57, %c0_58, %c0_59], %237 {strides = array<i32>} : memref<1x1x128xf32, #tpu.memory_space<vmem>>, vector<1x1x128xf32>,
    return
  }
  func.func @transform_0(%arg0: i32, %arg1: i32) -> (i32, i32) {
    %c0_i32 = arith.constant 0 : i32
    %c0_i32_0 = arith.constant 0 : i32
    return %c0_i32, %arg1 : i32, i32
  }
  func.func @transform_1(%arg0: i32, %arg1: i32) -> (i32, i32, i32) {
    %c0_i32 = arith.constant 0 : i32
    %c0_i32_0 = arith.constant 0 : i32
    %c0_i32_1 = arith.constant 0 : i32
    return %arg0, %c0_i32, %c0_i32_0 : i32, i32, i32
  }
  func.func @transform_2(%arg0: i32, %arg1: i32) -> (i32, i32, i32) {
    %c0_i32 = arith.constant 0 : i32
    %c0_i32_0 = arith.constant 0 : i32
    return %arg0, %c0_i32, %arg1 : i32, i32, i32
  }
}

</mosaic_0001>

<bundles_post_ra>
// kernel: tpu_custom_call.1
= control target key start
LH: loop header
LB: loop body
LE: loop exit
PB: predicated region body
PF: predicated region fallthrough
CT: control target
= control target key end

     0   :  { %7 = vsyncpa [#allocation3], 0  ;;  %s1684_s0 = inlined_call_operand.vmem [shape: f32[4,128], index: 0, kind: input, shape index: {}]   ;;  %s1685_s1 = inlined_call_operand.vmem [shape: f32[4,4,2], index: 1, kind: input, shape index: {}]   ;;  %s1686_s2 = inlined_call_operand.hbm [shape: f32[4,1,128], index: 2, kind: output, shape index: {}]  }
   0x1   :  { %9 = vsyncpa [#allocation3 + $0x1], 0  ;;  %s1281_s9 = smov 0   ;;  %s1283_s10 = smov 0  }
   0x2   :  { %s1285_s11 = smov 0   ;;  %s1287_s12 = smov 0  }
   0x3   :  { %s1289_s13 = smov 0   ;;  %s1291_s14 = smov 0  }
   0x4 LB: > { %s1040_s15 = sadd.s32 4294967295, %s1254_s14   ;;  %s1041_s16 = sadd.s32 4294967294, %s1254_s14   ;;  %s1254_s14 = sphi %s1291_s14, %s15_s14   ;;  %s1250_s13 = sphi %s1289_s13, %s1708_s13   ;;  %s1246_s12 = sphi %s1287_s12, %s1707_s12   ;;  %s1242_s11 = sphi %s1285_s11, %s1706_s11   ;;  %s1238_s10 = sphi %s1283_s10, %s1705_s10   ;;  %s1234_s9 = sphi %s1281_s9, %s1704_s9  }
   0x5   : > { %s27_s17 = sadd.s32 1, %s1250_s13  ;;  %s88_s18 = sadd.s32 1, %s1242_s11 }
   0x6   : > { %p29_p0 = scmp.ge.s32.totalorder %s27_s17, 4  ;;  %p98_p1 = scmp.ne.s32.totalorder %s1242_s11, %s1238_s10 }
   0x7   : > { %p99_p2 = scmp.eq.s32.totalorder %s1040_s15, 3  ;;  %p104_p3 = scmp.ne.s32.totalorder %s1238_s10, %s1234_s9 }
   0x8   : > { %s1710_s17 = smov (%p29_p0, %s27_s17), 0  ;;  %p105_p5 = scmp.eq.s32.totalorder %s1041_s16, 3 }
   0x9   : > { %p1321_p4 = por %p99_p2, %p98_p1  ;;  %s83_s20 = ssub.s32 %s1250_s13, %s1710_s17 }
   0xa   : > { %p1045_p6 = scmp.ge.s32.totalorder %s1254_s14, 1  ;;  %p86_p7 = scmp.eq.s32.totalorder %s83_s20, 0 }
   0xb   : > { %p1328_p8 = por %p105_p5, %p104_p3  ;;  %p137_p9 = scmp.lt.s32.totalorder %s1254_s14, 5 }
   0xc   : > { %s1334_s22 = scalar_select %p86_p7, %s1242_s11, %s88_s18  }
   0xd   : > { %p138_p10 = pnand %p1045_p6, %p137_p9 }
   0xe   : > { %p165_p11 = scmp.lt.s32.totalorder (!%p138_p10), %s1246_s12, 3  ;;  %s1263_s30 = smov (!%p138_p10), 127  }
   0xf   : > { %141 = sbr.rel (%p138_p10) target bundleno = 352 (0x160), region = 28 }
  0x14   : > { %v218_v0 = vld [vmem:[%s1684_s0] sm:$0xf]  ;;  %s166_s25 = scalar_select %p165_p11, %s1246_s12, 3  ;;  %v1256_v19 = vmov 683565275  }
  0x15   : > { %v1340_v1 = vmul.f32 0.5, %v218_v0  ;;  %v1257_v21 = vmov 2475754826   ;;  %v1258_v23 = vmov 2131351028  }
  0x16   : > { %s1046_s26 = sshll.u32 %s166_s25, 2  ;;  %v1259_v25 = vmov 2102212464   ;;  %v1260_v27 = vmov 920167782  }
  0x17   : > { %v223_v2 = vand.u32 2139095040, %v1340_v1  ;;  %v220_v3 = vand.u32 2147483647, %v1340_v1  ;;  %s168_s29 = scalar_lea.vmem %s1685_s1, %s1046_s26  ;;  %v1261_v36 = vmov 1326507024   ;;  %vm222_vm13 = vcmp.lt.s32.totalorder %v1340_v1, 0 }
  0x18   : > { %v427_v5 = vld [vmem:[%s168_s29] sm:$0xf]  ;;  %s159_s29 = sand.u32 1, %s1238_s10  }
  0x19   : > { %v224_v4 = vshrl.u32 %v223_v2, 23  ;;  %v1348_v7 = vmul.f32 0.5, %v427_v5  ;;  %v227_v8 = vand.u32 8388607, %v220_v3  ;;  %vm221_vm15 = vcmp.le.f32.partialorder %v220_v3, 0.7853982 }
  0x1b   : > { %v1047_v6 = vadd.s32 4294967169, %v224_v4  ;;  %v432_v10 = vand.u32 2139095040, %v1348_v7  ;;  %v228_v11 = vor.u32 8388608, %v227_v8  ;;  %v429_v13 = vand.u32 2147483647, %v1348_v7 }
  0x1d   : > { %v230_v9 = vadd.s32 1, %v1047_v6  ;;  %v433_v14 = vshrl.u32 %v432_v10, 23  ;;  %v268_v29 = vshll.u32 %v228_v11, 8  ;;  %v1356_v30 = vand.u32 8388607, %v429_v13 }
  0x1f   : > { %vm231_vm0 = vcmp.gt.s32.totalorder %v230_v9, 0  ;;  %v1055_v17 = vadd.s32 4294967169, %v433_v14  ;;  %v437_v0 = vor.u32 8388608, %v1356_v30 }
  0x20   : > { %v232_v12 = vsel %vm231_vm0, %v230_v9, 0  ;;  %vm431_vm0 = vcmp.lt.s32.totalorder %v1348_v7, 0 }
  0x21   : > { %v234_v15 = vand.u32 31, %v232_v12  ;;  %v233_v16 = vshrl.u32 %v232_v12, 5  ;;  %v439_v41 = vadd.s32 1, %v1055_v17 }
  0x23   : > { %v235_v18 = vsub.s32 32, %v234_v15  ;;  %v237_v20 = vshll.u32 %v1256_v19, %v234_v15  ;;  %v240_v22 = vshll.u32 %v1257_v21, %v234_v15  ;;  %v243_v24 = vshll.u32 %v1258_v23, %v234_v15 }
  0x24   : > { %v246_v26 = vshll.u32 %v1259_v25, %v234_v15  ;;  %v249_v28 = vshll.u32 %v1260_v27, %v234_v15  ;;  %vm252_vm1 = vcmp.lt.s32.totalorder %v233_v16, 1  ;;  %vm255_vm2 = vcmp.lt.s32.totalorder %v233_v16, 4 }
  0x25   : > { %v236_v31 = vshrl.u32 %v1256_v19, %v235_v18  ;;  %v238_v32 = vshrl.u32 %v1257_v21, %v235_v18  ;;  %v241_v33 = vshrl.u32 %v1258_v23, %v235_v18  ;;  %v244_v34 = vshrl.u32 %v1259_v25, %v235_v18 }
  0x26   : > { %v247_v35 = vshrl.u32 %v1260_v27, %v235_v18  ;;  %v250_v37 = vshrl.u32 %v1261_v36, %v235_v18  ;;  %vm253_vm3 = vcmp.lt.s32.totalorder %v233_v16, 2  ;;  %vm254_vm4 = vcmp.lt.s32.totalorder %v233_v16, 3 }
  0x27   : > { %v239_v38 = vor.u32 %v238_v32, %v237_v20  ;;  %v242_v39 = vor.u32 %v241_v33, %v240_v22  ;;  %v245_v40 = vor.u32 %v244_v34, %v243_v24  ;;  %vm440_vm5 = vcmp.gt.s32.totalorder %v439_v41, 0 }
  0x28   : > { %v248_v42 = vor.u32 %v247_v35, %v246_v26  ;;  %v251_v43 = vor.u32 %v250_v37, %v249_v28  ;;  %v441_v54 = vsel %vm440_vm5, %v439_v41, 0 }
  0x29   : > { %v256_v44 = vsel %vm252_vm1, %v236_v31, %v239_v38  ;;  %v257_v45 = vsel %vm255_vm2, %v245_v40, 2102212464  ;;  %v260_v46 = vsel %vm252_vm1, %v239_v38, %v242_v39  ;;  %v264_v47 = vsel %vm252_vm1, %v242_v39, %v245_v40 }
  0x2a   : > { %v258_v48 = vsel %vm254_vm4, %v242_v39, %v257_v45  ;;  %v261_v49 = vsel %vm255_vm2, %v248_v42, 920167782  ;;  %v265_v50 = vsel %vm255_vm2, %v251_v43, 1326507024  ;;  %v442_v57 = vshrl.u32 %v441_v54, 5 }
  0x2b   : > { %v259_v51 = vsel %vm253_vm3, %v256_v44, %v258_v48  ;;  %v262_v52 = vsel %vm254_vm4, %v245_v40, %v261_v49  ;;  %v266_v53 = vsel %vm254_vm4, %v248_v42, %v265_v50  ;;  %v443_v62 = vand.u32 31, %v441_v54 }
  0x2c   : > { %v263_v55 = vsel %vm253_vm3, %v260_v46, %v262_v52  ;;  %v267_v56 = vsel %vm253_vm3, %v264_v47, %v266_v53  ;;  %v275_v63 = vmul.u32 %v268_v29, %v259_v51  ;;  %vm461_vm6 = vcmp.lt.s32.totalorder %v442_v57, 1 }
  0x2d   : > { %v1358_v58 = vmul.u32.u64.low %v268_v29, %v267_v56  ;;  %v1359_v59 = vmul.u32.u64.high %v268_v29, %v267_v56, %v1358_v58  ;;  %v1361_v60 = vmul.u32.u64.low %v268_v29, %v263_v55  ;;  %v1362_v61 = vmul.u32.u64.high %v268_v29, %v263_v55, %v1361_v60 }
  0x2e   : > { %vm464_vm7 = vcmp.lt.s32.totalorder %v442_v57, 4  ;;  %v444_v2 = vsub.s32 32, %v443_v62  ;;  %v446_v4 = vshll.u32 %v1256_v19, %v443_v62  ;;  %v449_v5 = vshll.u32 %v1257_v21, %v443_v62 }
  0x2f   : > { %v452_v6 = vshll.u32 %v1258_v23, %v443_v62  ;;  %v276_v8 = vadd.s32 %v1361_v60, %v1359_v59  ;;  %vm277_vm8 = vc.u32 %v1359_v59, %v1361_v60  ;;  %v278_v9 = vadd.s32 1, %v1362_v61 }
  0x30   : > { %v455_v10 = vshll.u32 %v1259_v25, %v443_v62  ;;  %v445_v11 = vshrl.u32 %v1256_v19, %v444_v2  ;;  %v447_v12 = vshrl.u32 %v1257_v21, %v444_v2  ;;  %v450_v14 = vshrl.u32 %v1258_v23, %v444_v2 }
  0x31   : > { %v453_v15 = vshrl.u32 %v1259_v25, %v444_v2  ;;  %v279_v16 = vsel %vm277_vm8, %v278_v9, %v1362_v61  ;;  %v456_v17 = vshrl.u32 %v1260_v27, %v444_v2  ;;  %v458_v18 = vshll.u32 %v1260_v27, %v443_v62 }
  0x32   : > { %v459_v20 = vshrl.u32 %v1261_v36, %v444_v2  ;;  %v280_v22 = vadd.s32 %v279_v16, %v275_v63  ;;  %v448_v24 = vor.u32 %v447_v12, %v446_v4  ;;  %v451_v26 = vor.u32 %v450_v14, %v449_v5 }
  0x33   : > { %v454_v28 = vor.u32 %v453_v15, %v452_v6  ;;  %v457_v29 = vor.u32 %v456_v17, %v455_v10  ;;  %vm463_vm9 = vcmp.lt.s32.totalorder %v442_v57, 3  ;;  %v477_v31 = vshll.u32 %v437_v0, 8 }
  0x34   : > { %v460_v30 = vor.u32 %v459_v20, %v458_v18  ;;  %v281_v32 = vadd.s32 536870912, %v280_v22  ;;  %vm462_vm10 = vcmp.lt.s32.totalorder %v442_v57, 2  ;;  %v469_v21 = vsel %vm461_vm6, %v448_v24, %v451_v26 }
  0x35   : > { %v466_v19 = vsel %vm464_vm7, %v454_v28, 2102212464  ;;  %v465_v23 = vsel %vm461_vm6, %v445_v11, %v448_v24  ;;  %v470_v25 = vsel %vm464_vm7, %v457_v29, 920167782  ;;  %v473_v27 = vsel %vm461_vm6, %v451_v26, %v454_v28 }
  0x36   : > { %v474_v33 = vsel %vm464_vm7, %v460_v30, 1326507024  ;;  %v282_v34 = vshrl.u32 %v281_v32, 30  ;;  %v467_v35 = vsel %vm463_vm9, %v451_v26, %v466_v19  ;;  %v471_v36 = vsel %vm463_vm9, %v454_v28, %v470_v25 }
  0x37   : > { %v475_v37 = vsel %vm463_vm9, %v457_v29, %v474_v33  ;;  %v472_v38 = vsel %vm462_vm10, %v469_v21, %v471_v36  ;;  %v468_v43 = vsel %vm462_vm10, %v465_v23, %v467_v35  ;;  %v169_v17 = vlaneseq }
  0x38   : > { %v476_v39 = vsel %vm462_vm10, %v473_v27, %v475_v37  ;;  %v283_v40 = vshll.u32 %v282_v34, 30  ;;  %v1378_v44 = vmul.u32.u64.low %v477_v31, %v472_v38  ;;  %v1379_v45 = vmul.u32.u64.high %v477_v31, %v472_v38, %v1378_v44 }
  0x39   : > { %v1375_v41 = vmul.u32.u64.low %v477_v31, %v476_v39  ;;  %v1376_v42 = vmul.u32.u64.high %v477_v31, %v476_v39, %v1375_v41  ;;  %v484_v48 = vmul.u32 %v477_v31, %v468_v43  ;;  %v306_v16 = vsub.s32 4, %v282_v34 }
  0x3a   : > { %v284_v46 = vsub.s32 %v280_v22, %v283_v40  ;;  %v487_v49 = vadd.s32 1, %v1379_v45  ;;  %v1392_v19 = vshrl.u32 %v169_v17, 7  ;;  %vm1403_vm1 = vcmp.le.f32.partialorder %v429_v13, 0.7853982 }
  0x3b   : > { %vm486_vm11 = vc.u32 %v1376_v42, %v1378_v44  ;;  %v485_v20 = vadd.s32 %v1378_v44, %v1376_v42  ;;  %v307_v29 = vsel %vm222_vm13, %v306_v16, %v282_v34  ;;  %vm312_vm10 = vweird.f32 %v1340_v1 }
  0x3c   : > { %v286_v47 = vsub.s32 0, %v284_v46  ;;  %v488_v51 = vsel %vm486_vm11, %v487_v49, %v1379_v45  ;;  %v309_v25 = vsel %vm221_vm15, 0, %v307_v29  ;;  %v1395_v3 = vadd.s32 8, %v1392_v19 }
  0x3d   : > { %v489_v53 = vadd.s32 %v488_v51, %v484_v48  ;;  %v416_v35 = vadd.s32 3, %v309_v25  ;;  %v172_v34 = vand.u32 1, %v1392_v19  ;;  %v174_v39 = vshra.s32 %v1392_v19, 1 }
  0x3e   : > { %v1048_v50 = vmin.u32 %v286_v47, %v284_v46  ;;  %v173_v38 = vand.u32 1, %v1395_v3  ;;  %v313_v40 = vand.u32 3, %v309_v25  ;;  %v175_v45 = vshra.s32 %v1395_v3, 1 }
  0x3f   : > { %v490_v55 = vadd.s32 536870912, %v489_v53  ;;  %v417_v41 = vand.u32 3, %v416_v35  ;;  %v1411_v47 = vand.u32 1, %v174_v39  ;;  %vm1415_vm2 = vcmp.eq.s32.totalorder %v172_v34, 1 }
  0x40   : > { %v288_v52 = vclz %v1048_v50  ;;  %vm1421_vm3 = vcmp.eq.s32.totalorder %v173_v38, 1  ;;  %vm314_vm4 = vcmp.lt.s32.totalorder %v313_v40, 2  ;;  %vm318_vm5 = vcmp.eq.s32.totalorder %v313_v40, 2 }
  0x41   : > { %v1384_v56 = vshrl.u32 %v490_v55, 30  ;;  %vm422_vm6 = vcmp.eq.s32.totalorder %v417_v41, 2  ;;  %vm315_vm7 = vcmp.eq.s32.totalorder %v313_v40, 0  ;;  %vm419_vm8 = vcmp.eq.s32.totalorder %v417_v41, 0 }
  0x42   : > { %v1049_v54 = vadd.s32 4294967294, %v288_v52  ;;  %vm418_vm9 = vcmp.lt.s32.totalorder %v417_v41, 2  ;;  %vm521_vm11 = vweird.f32 %v1348_v7 }
  0x43   : > { %v492_v61 = vshll.u32 %v1384_v56, 30  ;;  %v515_v44 = vsub.s32 4, %v1384_v56 }
  0x44   : > { %vm1050_vm12 = vcmp.lt.s32.totalorder %v1049_v54, 0 }
  0x45   : > { %v291_v57 = vsel %vm1050_vm12, 0, %v1049_v54  ;;  %v493_v0 = vsub.s32 %v489_v53, %v492_v61  ;;  %v516_v53 = vsel %vm431_vm0, %v515_v44, %v1384_v56  ;;  %vm188_vm12 = vcmp.eq.s32.totalorder %v1411_v47, 1 }
  0x46   : > { %v292_v58 = vsub.s32 32, %v291_v57  ;;  %v293_v59 = vshll.u32 %v284_v46, %v291_v57  ;;  %v296_v60 = vsub.s32 4294967266, %v291_v57  ;;  %v518_v56 = vsel %vm1403_vm1, 0, %v516_v53 }
  0x47   : > { %v495_v5 = vsub.s32 0, %v493_v0 }
  0x48   : > { %v294_v62 = vshrl.u32 %v276_v8, %v292_v58  ;;  %v297_v63 = vadd.s32 127, %v296_v60  ;;  %v638_v58 = vsub.s32 0, %v1392_v19 }
  0x49   : > { %v1056_v10 = vmin.u32 %v495_v5, %v493_v0 }
  0x4a   : > { %v295_v2 = vor.u32 %v294_v62, %v293_v59  ;;  %v298_v4 = vshll.u32 %v297_v63, 23  ;;  %v1433_v59 = vand.u32 1, %v175_v45  ;;  %v1262_v62 = vmov -0.25  }
  0x4b   : > { %v497_v12 = vclz %v1056_v10  ;;  %v648_v63 = vsel %vm1415_vm2, 0.25, %v1262_v62 }
  0x4c   : > { %v299_v6 = vor.u32 4788187, %v298_v4  ;;  %v302_v9 = vcvt.s32.f32 %v295_v2  ;;  %v625_v4 = vadd.s32 3, %v518_v56 }
  0x4d   : > { %v1057_v15 = vadd.s32 4294967294, %v497_v12  ;;  %v522_v12 = vand.u32 3, %v518_v56  ;;  %v182_v56 = vshra.s32 %v1392_v19, 3 }
  0x4e   : > { %v300_v11 = vand.u32 2147483647, %v299_v6 }
  0x4f   : > { %vm1058_vm14 = vcmp.lt.s32.totalorder %v1057_v15, 0 }
  0x50   : > { %v303_v14 = vmul.f32 %v302_v9, %v300_v11  ;;  %v500_v8 = vsel %vm1058_vm14, 0, %v1057_v15  ;;  %v649_v9 = vsel %vm1421_vm3, 0.25, %v1262_v62  ;;  %v179_v15 = vshra.s32 %v1395_v3, 2 }
  0x51   : > { %v501_v22 = vsub.s32 32, %v500_v8  ;;  %v502_v24 = vshll.u32 %v493_v0, %v500_v8  ;;  %v505_v26 = vsub.s32 4294967266, %v500_v8  ;;  %v626_v8 = vand.u32 3, %v625_v4 }
  0x52   : > { %v304_v18 = vxor.u32 2147483648, %v303_v14  ;;  %vm666_vm14 = vcmp.lt.s32.totalorder %v1392_v19, 2  ;;  %v1485_v62 = vand.u32 1, %v179_v15  ;;  %v719_v15 = vsub.s32 3, %v1392_v19 }
  0x53   : > { %v503_v31 = vshrl.u32 %v485_v20, %v501_v22  ;;  %v506_v32 = vadd.s32 127, %v505_v26  ;;  %v692_v26 = vsub.s32 2, %v1392_v19 }
  0x54   : > { %v305_v28 = vsel %vm222_vm13, %v304_v18, %v303_v14  ;;  %v178_v14 = vshra.s32 %v1392_v19, 2  ;;  %vm1687_vm13 = vcmp.eq.s32.totalorder %v1433_v59, 1 }
  0x55   : > { %v308_v30 = vsel %vm221_vm15, %v1340_v1, %v305_v28  ;;  %v504_v21 = vor.u32 %v503_v31, %v502_v24  ;;  %v507_v23 = vshll.u32 %v506_v32, 23  ;;  %v660_v1 = vsub.s32 1, %v1392_v19 }
  0x56   : > { %1170 = vcosq.f32 %v308_v30  ;;  %vm671_vm15 = vcmp.lt.s32.totalorder %v1392_v19, 6 }
  0x57   : > { %1172 = vsinq.f32 %v308_v30  ;;  %v508_v27 = vor.u32 4788187, %v507_v23  ;;  %v511_v33 = vcvt.s32.f32 %v504_v21 }
  0x59   : > { %v509_v36 = vand.u32 2147483647, %v508_v27 }
  0x5b   : > { %v512_v37 = vmul.f32 %v511_v33, %v509_v36 }
  0x5d   : > { %v513_v43 = vxor.u32 2147483648, %v512_v37 }
  0x5f   : > { %v514_v46 = vsel %vm431_vm0, %v513_v43, %v512_v37  ;;  %vm523_vm0 = vcmp.lt.s32.totalorder %v522_v12, 2 }
  0x60   : > { %v517_v50 = vsel %vm1403_vm1, %v1348_v7, %v514_v46  ;;  %vm524_vm1 = vcmp.eq.s32.totalorder %v522_v12, 0  ;;  %v183_v7 = vshra.s32 %v1395_v3, 3 }
  0x61   : > { %1174 = vcosq.f32 %v517_v50 }
  0x62   : > { %1176 = vsinq.f32 %v517_v50 }
  0x63   : > { %v1171_v49 = vpop.eup %1170 }
  0x64   : > { %v1173_v51 = vpop.eup %1172  ;;  %v319_v52 = vxor.u32 2147483648, %v1171_v49 }
  0x65   : > { %v316_v54 = vxor.u32 2147483648, %v1173_v51 }
  0x66   : > { %v320_v55 = vsel %vm318_vm5, %v319_v52, %v1173_v51  ;;  %v424_v57 = vsel %vm422_vm6, %v319_v52, %v1173_v51  ;;  %vm627_vm5 = vcmp.lt.s32.totalorder %v626_v8, 2  ;;  %vm631_vm6 = vcmp.eq.s32.totalorder %v626_v8, 2 }
  0x67   : > { %v317_v60 = vsel %vm315_vm7, %v1171_v49, %v316_v54  ;;  %v421_v61 = vsel %vm419_vm8, %v1171_v49, %v316_v54  ;;  %vm628_vm7 = vcmp.eq.s32.totalorder %v626_v8, 0  ;;  %vm1688_vm8 = vcmp.lt.s32.totalorder %v1392_v19, 4 }
  0x68   : > { %v321_v0 = vsel %vm314_vm4, %v317_v60, %v320_v55  ;;  %v425_v2 = vsel %vm418_vm9, %v421_v61, %v424_v57  ;;  %vm527_vm4 = vcmp.eq.s32.totalorder %v522_v12, 2  ;;  %v1483_v61 = vand.u32 1, %v178_v14 }
  0x69   : > { %v1441_v5 = vsel %vm312_vm10, nan, %v321_v0  ;;  %v1443_v6 = vsel %vm312_vm10, nan, %v425_v2  ;;  %vm191_vm10 = vcmp.eq.s32.totalorder %v1485_v62, 1 }
  0x6a   : > { %v639_v10 = vrot.slane %v1441_v5, %v638_v58  ;;  %v653_v11 = vrot.slane %v1443_v6, %v638_v58  ;;  %v661_v20 = vrot.slane %v1441_v5, %v660_v1  ;;  %v685_v40 = vrot.slane %v1443_v6, %v660_v1 }
  0x6b   : > { %v693_v57 = vrot.slane %v1441_v5, %v692_v26  ;;  %vm190_vm9 = vcmp.eq.s32.totalorder %v1483_v61, 1 }
  0x6c   : > { %v640_v16 = vmul.f32 0.25, %v639_v10  ;;  %v654_v17 = vmul.f32 %v653_v11, %v648_v63  ;;  %v655_v18 = vmul.f32 %v653_v11, %v649_v9 }
  0x6e   : > { %v656_v22 = vadd.f32 %v654_v17, %v640_v16  ;;  %v657_v24 = vadd.f32 %v655_v18, %v640_v16  ;;  %v1175_v32 = vpop.eup %1174 }
  0x6f   : > { %v1177_v25 = vpop.eup %1176  ;;  %v528_v27 = vxor.u32 2147483648, %v1175_v32 }
  0x70   : > { %v662_v28 = vmul.f32 %v661_v20, %v656_v22  ;;  %v663_v29 = vmul.f32 %v661_v20, %v657_v24  ;;  %v664_v30 = vrot.slane %v656_v22, 6  ;;  %v665_v31 = vrot.slane %v657_v24, 6 }
  0x71   : > { %v669_v21 = vrot.slane %v656_v22, 2  ;;  %v670_v23 = vrot.slane %v657_v24, 2  ;;  %v525_v36 = vxor.u32 2147483648, %v1177_v25  ;;  %v529_v41 = vsel %vm527_vm4, %v528_v27, %v1177_v25 }
  0x72   : > { %v667_v33 = vsel %vm666_vm14, %v664_v30, %v665_v31  ;;  %v668_v35 = vsel %vm666_vm14, %v665_v31, %v664_v30  ;;  %v633_v42 = vsel %vm631_vm6, %v528_v27, %v1177_v25  ;;  %v712_v20 = vrot.slane %v1443_v6, %v692_v26 }
  0x73   : > { %v672_v37 = vsel %vm671_vm15, %v669_v21, %v670_v23  ;;  %v673_v39 = vsel %vm671_vm15, %v670_v23, %v669_v21  ;;  %v526_v45 = vsel %vm524_vm1, %v1175_v32, %v525_v36  ;;  %v630_v46 = vsel %vm628_vm7, %v1175_v32, %v525_v36 }
  0x74   : > { %v674_v43 = vsub.f32 0.0, %v672_v37  ;;  %v675_v44 = vsub.f32 0.0, %v673_v39  ;;  %v530_v49 = vsel %vm523_vm0, %v526_v45, %v529_v41  ;;  %v634_v50 = vsel %vm627_vm5, %v630_v46, %v633_v42 }
  0x75   : > { %v531_v53 = vsel %vm521_vm11, nan, %v530_v49  ;;  %v635_v58 = vsel %vm521_vm11, nan, %v634_v50  ;;  %v1504_v24 = vand.u32 1, %v182_v56  ;;  %v720_v32 = vrot.slane %v1441_v5, %v719_v15 }
  0x76   : > { %v680_v51 = vsel %vm188_vm12, %v668_v35, %v674_v43  ;;  %v681_v52 = vsel %vm1687_vm13, %v667_v33, %v675_v44  ;;  %833 = vrot.lane.b32.xlu0 %v531_v53, %s1263_s30  ;;  %v765_v60 = vrot.slane %v531_v53, 1  ;;  %1074 = vpush %v531_v53  ;;  %v783_v63 = vrot.slane %v635_v58, 1 }
  0x77   : > { %v686_v54 = vmul.f32 %v685_v40, %v680_v51  ;;  %v687_v55 = vmul.f32 %v685_v40, %v681_v52  ;;  %1076 = vpush %v635_v58  ;;  %v791_v1 = vrot.slane %v531_v53, 2  ;;  %v805_v4 = vrot.slane %v635_v58, 2 }
  0x78   : > { %861 = vrot.lane.b32.xlu1 %v765_v60, %s1263_s30  ;;  %1078 = vpush %v765_v60  ;;  %v813_v14 = vrot.slane %v531_v53, 3  ;;  %v823_v16 = vrot.slane %v635_v58, 3  ;;  %vm192_vm11 = vcmp.eq.s32.totalorder %v1504_v24, 1  ;;  %v734_v25 = vrot.slane %v1443_v6, %v719_v15 }
  0x79   : > { %v688_v0 = vadd.f32 %v686_v54, %v662_v28  ;;  %v689_v2 = vadd.f32 %v687_v55, %v663_v29  ;;  %1080 = vpush %v783_v63  ;;  %v1506_v28 = vand.u32 1, %v183_v7  ;;  %vm641_vm1 = vcmp.lt.s32.totalorder %v1392_v19, 1 }
  0x7a   : > { %852 = vrot.lane.b32.xlu0 %v635_v58, %s1263_s30  ;;  %1082 = vpush %v791_v1  ;;  %vm642_vm4 = vcmp.lt.s32.totalorder %v1392_v19, 7 }
  0x7b   : > { %v694_v9 = vmul.f32 %v693_v57, %v688_v0  ;;  %v695_v10 = vmul.f32 %v693_v57, %v689_v2  ;;  %v696_v11 = vrot.slane %v688_v0, 4  ;;  %v697_v12 = vrot.slane %v689_v2, 4  ;;  %1084 = vpush %v805_v4 }
  0x7c   : > { %880 = vrot.lane.b32.xlu1 %v783_v63, %s1263_s30  ;;  %1086 = vpush %v813_v14  ;;  %vm193_vm0 = vcmp.eq.s32.totalorder %v1506_v28, 1 }
  0x7d   : > { %v699_v17 = vsel %vm1688_vm8, %v696_v11, %v697_v12  ;;  %v700_v18 = vsel %vm1688_vm8, %v697_v12, %v696_v11  ;;  %1088 = vpush %v823_v16 }
  0x7e   : > { %v701_v8 = vsub.f32 0.0, %v699_v17  ;;  %v702_v22 = vsub.f32 0.0, %v700_v18  ;;  %889 = vrot.lane.b32.xlu0 %v791_v1, %s1263_s30 }
  0x80   : > { %v707_v29 = vsel %vm190_vm9, %v700_v18, %v701_v8  ;;  %v708_v30 = vsel %vm191_vm10, %v699_v17, %v702_v22  ;;  %904 = vrot.lane.b32.xlu1 %v805_v4, %s1263_s30 }
  0x81   : > { %v713_v31 = vmul.f32 %v712_v20, %v707_v29  ;;  %v714_v26 = vmul.f32 %v712_v20, %v708_v30 }
  0x82   : > { %913 = vrot.lane.b32.xlu0 %v813_v14, %s1263_s30 }
  0x83   : > { %v715_v21 = vadd.f32 %v713_v31, %v694_v9  ;;  %v716_v23 = vadd.f32 %v714_v26, %v695_v10  ;;  %v195_v31 = vand.u32 %v1433_v59, %v173_v38 }
  0x84   : > { %924 = vrot.lane.b32.xlu1 %v823_v16, %s1263_s30  ;;  %s1063_s30 = sshll.u32 %s1246_s12, 4 }
  0x85   : > { %v721_v27 = vmul.f32 %v720_v32, %v715_v21  ;;  %v722_v33 = vmul.f32 %v720_v32, %v716_v23  ;;  %v723_v35 = vsub.f32 0.0, %v716_v23  ;;  %v724_v36 = vsub.f32 0.0, %v715_v21 }
  0x86   : > { %vm197_vm5 = vcmp.eq.s32.totalorder %v195_v31, 1 }
  0x87   : > { %v729_v5 = vsel %vm192_vm11, %v716_v23, %v723_v35  ;;  %v730_v37 = vsel %vm193_vm0, %v715_v21, %v724_v36  ;;  %v194_v21 = vand.u32 %v1411_v47, %v172_v34  ;;  %v200_v23 = vand.u32 %v1483_v61, %v1411_v47 }
  0x88   : > { %v735_v39 = vmul.f32 %v734_v25, %v729_v5  ;;  %v736_v40 = vmul.f32 %v734_v25, %v730_v37 }
  0x89   : > { %vm196_vm6 = vcmp.eq.s32.totalorder %v194_v21, 1  ;;  %vm1559_vm7 = vcmp.eq.s32.totalorder %v200_v23, 1 }
  0x8a   : > { %v737_v41 = vadd.f32 %v735_v39, %v721_v27  ;;  %v738_v42 = vadd.f32 %v736_v40, %v722_v33  ;;  %v201_v33 = vand.u32 %v1485_v62, %v1433_v59  ;;  %v206_v39 = vand.u32 %v1504_v24, %v1483_v61 }
  0x8c   : > { %v745_v6 = vrot.slane %v737_v41, 7  ;;  %v746_v43 = vrot.slane %v738_v42, 7  ;;  %v749_v44 = vrot.slane %v737_v41, 1  ;;  %v750_v45 = vrot.slane %v738_v42, 1 }
  0x8e   : > { %v747_v46 = vsel %vm641_vm1, %v745_v6, %v746_v43  ;;  %v748_v49 = vsel %vm641_vm1, %v746_v43, %v745_v6  ;;  %v751_v50 = vsel %vm642_vm4, %v749_v44, %v750_v45  ;;  %v752_v51 = vsel %vm642_vm4, %v750_v45, %v749_v44 }
  0x8f   : > { %v753_v52 = vsub.f32 0.0, %v751_v50  ;;  %v754_v53 = vsub.f32 0.0, %v752_v51  ;;  %v207_v6 = vand.u32 %v1506_v28, %v1485_v62  ;;  %v1264_v45 = vmov 1.0  }
  0x90   : > { %v198_v51 = vsel %vm196_vm6, -1.0, %v1264_v45  ;;  %v216_v24 = vsel %vm1415_vm2, -1.0, %v1264_v45  ;;  %v217_v28 = vsel %vm1421_vm3, -1.0, %v1264_v45 }
  0x91   : > { %v755_v54 = vsel %vm1415_vm2, %v748_v49, %v753_v52  ;;  %v756_v55 = vsel %vm1421_vm3, %v747_v46, %v754_v53  ;;  %v199_v46 = vsel %vm197_vm5, -1.0, %v1264_v45  ;;  %v204_v52 = vsel %vm1559_vm7, -1.0, %v1264_v45 }
  0x92   : > { %vm208_vm5 = vcmp.eq.s32.totalorder %v206_v39, 1 }
  0xa7   : > { %s1075_s3 = spop %1074 }
  0xa8   : > { %v741_v57 = vstv %s1075_s3  ;;  %s1077_s4 = spop %1076  ;;  %s160_s3 = scalar_lea.vmem [#allocation2], %s159_s29 }
  0xa9   : > { %v743_v58 = vmul.f32 %v741_v57, %v737_v41  ;;  %v744_v60 = vmul.f32 %v741_v57, %v738_v42  ;;  %v759_v63 = vstv %s1077_s4  ;;  %s1079_s5 = spop %1078  ;;  %s961_s4 = sshll.u32 %s160_s3, 4  ;;  %s962_s4 = int_to_ptr.vmem [resolvable:$true] %s961_s4 }
  0xaa   : > { %v761_v56 = vmul.f32 %v759_v63, %v755_v54  ;;  %v762_v0 = vmul.f32 %v759_v63, %v756_v55  ;;  %s1081_s6 = spop %1080  ;;  %v767_v11 = vstv %s1079_s5  ;;  %v210_v63 = vsel %vm208_vm5, -1.0, %v1264_v45 }
  0xab   : > { %v785_v20 = vstv %s1081_s6  ;;  %s1083_s7 = spop %1082 }
  0xac   : > { %v763_v2 = vadd.f32 %v761_v56, %v743_v58  ;;  %v764_v1 = vadd.f32 %v762_v0, %v744_v60  ;;  %s1085_s8 = spop %1084  ;;  %v793_v38 = vstv %s1083_s7  ;;  %v212_v56 = vmul.f32 %v204_v52, %v198_v51  ;;  %s959_s7 = scalar_lea.hbm %s1686_s2, %s1063_s30 }
  0xad   : > { %v807_v42 = vstv %s1085_s8  ;;  %s1087_s15 = spop %1086  ;;  %s948_s8 = scalar_lea.sflag [#allocation3], %s159_s29 }
  0xae   : > { %v771_v4 = vrot.slane %v763_v2, 6  ;;  %v772_v7 = vrot.slane %v764_v1, 6  ;;  %v775_v9 = vrot.slane %v763_v2, 2  ;;  %v776_v10 = vrot.slane %v764_v1, 2  ;;  %s1089_s16 = spop %1088 }
  0xaf   : > { %v769_v8 = vmul.f32 %v767_v11, %v763_v2  ;;  %v770_v22 = vmul.f32 %v767_v11, %v764_v1  ;;  %v815_v60 = vstv %s1087_s15  ;;  %s1178_s15 = scalar_lea.vmem %s962_s4, 16 }
  0xb0   : > { %v773_v12 = vsel %vm666_vm14, %v771_v4, %v772_v7  ;;  %v774_v14 = vsel %vm666_vm14, %v772_v7, %v771_v4  ;;  %v777_v15 = vsel %vm671_vm15, %v775_v9, %v776_v10  ;;  %v778_v16 = vsel %vm671_vm15, %v776_v10, %v775_v9  ;;  %p1179_p12 = scmp.ne.s32.totalorder %s962_s4, %s1178_s15 }
  0xb1   : > { %v779_v17 = vsub.f32 0.0, %v777_v15  ;;  %v780_v18 = vsub.f32 0.0, %v778_v16  ;;  %v825_v7 = vstv %s1089_s16  ;;  %s1265_s16 = smov [#allocation2]  }
  0xb2   : > { %p1180_p13 = pnand %p1179_p12, %p1321_p4 }
  0xb3   : > { %v781_v29 = vsel %vm188_vm12, %v774_v14, %v779_v17  ;;  %v782_v30 = vsel %vm1687_vm13, %v773_v12, %v780_v18  ;;  %vm1567_vm13 = vcmp.eq.s32.totalorder %v201_v33, 1  ;;  %v1595_v14 = vmul.f32 %v212_v56, %v210_v63 }
  0xb4   : > { %v787_v26 = vmul.f32 %v785_v20, %v781_v29  ;;  %v788_v32 = vmul.f32 %v785_v20, %v782_v30  ;;  %v205_v55 = vsel %vm1567_vm13, -1.0, %v1264_v45  ;;  %vm1701_vm13 = vcmp.eq.s32.totalorder %v1433_v59, 1  ;;  %p1181_p0 = pneg %p1180_p13 }
  0xb5   : > { %v213_v0 = vmul.f32 %v205_v55, %v199_v46 }
  0xb6   : > { %v789_v25 = vadd.f32 %v787_v26, %v769_v8  ;;  %v790_v27 = vadd.f32 %v788_v32, %v770_v22 }
  0xb8   : > { %v797_v35 = vrot.slane %v789_v25, 4  ;;  %v798_v3 = vrot.slane %v790_v27, 4  ;;  %v795_v43 = vmul.f32 %v793_v38, %v789_v25  ;;  %v796_v44 = vmul.f32 %v793_v38, %v790_v27 }
  0xba   : > { %v799_v34 = vsel %vm1688_vm8, %v797_v35, %v798_v3  ;;  %v800_v5 = vsel %vm1688_vm8, %v798_v3, %v797_v35  ;;  %vm209_vm8 = vcmp.eq.s32.totalorder %v207_v6, 1 }
  0xbb   : > { %v801_v40 = vsub.f32 0.0, %v799_v34  ;;  %v802_v41 = vsub.f32 0.0, %v800_v5  ;;  %v211_v2 = vsel %vm209_vm8, -1.0, %v1264_v45 }
  0xbc   : > { %v1597_v15 = vmul.f32 %v213_v0, %v211_v2 }
  0xbd   : > { %v803_v49 = vsel %vm190_vm9, %v800_v5, %v801_v40  ;;  %v804_v50 = vsel %vm191_vm10, %v799_v34, %v802_v41 }
  0xbe   : > { %v809_v53 = vmul.f32 %v807_v42, %v803_v49  ;;  %v810_v54 = vmul.f32 %v807_v42, %v804_v50 }
  0xc0   : > { %v811_v57 = vadd.f32 %v809_v53, %v795_v43  ;;  %v812_v58 = vadd.f32 %v810_v54, %v796_v44 }
  0xc2   : > { %v819_v1 = vsub.f32 0.0, %v812_v58  ;;  %v820_v4 = vsub.f32 0.0, %v811_v57  ;;  %v817_v9 = vmul.f32 %v815_v60, %v811_v57  ;;  %v818_v10 = vmul.f32 %v815_v60, %v812_v58 }
  0xc4   : > { %v821_v11 = vsel %vm192_vm11, %v812_v58, %v819_v1  ;;  %v822_v12 = vsel %vm193_vm0, %v811_v57, %v820_v4 }
  0xc5   : > { %v827_v16 = vmul.f32 %v825_v7, %v821_v11  ;;  %v828_v17 = vmul.f32 %v825_v7, %v822_v12 }
  0xc7   : > { %v829_v18 = vadd.f32 %v827_v16, %v817_v9  ;;  %v830_v20 = vadd.f32 %v828_v17, %v818_v10 }
  0xc9   : > { %v831_v8 = vmul.f32 %v829_v18, %v1595_v14  ;;  %v832_v22 = vmul.f32 %v830_v20, %v1597_v15 }
  0xcb   : > { %v844_v29 = vrot.slane %v831_v8, 1  ;;  %v845_v30 = vrot.slane %v832_v22, 1  ;;  %v840_v31 = vrot.slane %v831_v8, 7  ;;  %v841_v26 = vrot.slane %v832_v22, 7 }
  0xcd   : > { %v842_v32 = vsel %vm641_vm1, %v840_v31, %v841_v26  ;;  %v843_v21 = vsel %vm641_vm1, %v841_v26, %v840_v31  ;;  %v846_v23 = vsel %vm642_vm4, %v844_v29, %v845_v30  ;;  %v847_v25 = vsel %vm642_vm4, %v845_v30, %v844_v29 }
  0xce   : > { %v848_v27 = vsub.f32 0.0, %v846_v23  ;;  %v849_v33 = vsub.f32 0.0, %v847_v25 }
  0xd0   : > { %v850_v35 = vsel %vm1415_vm2, %v843_v21, %v848_v27  ;;  %v851_v3 = vsel %vm1421_vm3, %v842_v32, %v849_v33 }
  0xe8   : > { %v834_v38 = vpop.permute.xlu0 %833 }
  0xe9   : > { %1090 = vpush %v834_v38 }
  0xea   : > { %v862_v36 = vpop.permute.xlu1 %861 }
  0xec   : > { %v853_v34 = vpop.permute.xlu0 %852 }
  0xed   : > { %1092 = vpush %v853_v34 }
  0xee   : > { %1094 = vpush %v862_v36  ;;  %v881_v5 = vpop.permute.xlu1 %880 }
  0xef   : > { %1096 = vpush %v881_v5 }
  0xf0   : > { %v890_v37 = vpop.permute.xlu0 %889 }
  0xf1   : > { %1098 = vpush %v890_v37 }
  0xf2   : > { %v905_v39 = vpop.permute.xlu1 %904 }
  0xf3   : > { %1100 = vpush %v905_v39 }
  0xf4   : > { %v914_v40 = vpop.permute.xlu0 %913 }
  0xf5   : > { %1102 = vpush %v914_v40 }
  0xf6   : > { %v925_v41 = vpop.permute.xlu1 %924 }
  0xf7   : > { %1104 = vpush %v925_v41 }
 0x11a   : > { %s1091_s18 = spop %1090 }
 0x11b   : > { %v836_v42 = vstv %s1091_s18  ;;  %s1182_s18 = sshll.u32 %s1265_s16, 4  ;;  %s1183_s18 = int_to_ptr.vmem [resolvable:$false] %s1182_s18 }
 0x11c   : > { %v838_v43 = vmul.f32 %v836_v42, %v831_v8  ;;  %v839_v44 = vmul.f32 %v836_v42, %v832_v22  ;;  %s1184_s12 = scalar_lea.vmem %s1183_s18, 32  ;;  %p1185_p1 = scmp.lt.s32.totalorder %s962_s4, %s1183_s18 }
 0x11d   : > { %p1186_p2 = scmp.lt.s32.totalorder %s1184_s12, %s1178_s15 }
 0x11e   : > { %s1093_s20 = spop %1092 }
 0x11f   : > { %v855_v6 = vstv %s1093_s20  ;;  %s1095_s23 = spop %1094  ;;  %p1187_p3 = por %p1186_p2, %p1185_p1 }
 0x120   : > { %v857_v46 = vmul.f32 %v855_v6, %v850_v35  ;;  %v858_v49 = vmul.f32 %v855_v6, %v851_v3  ;;  %s1097_s24 = spop %1096  ;;  %v864_v56 = vstv %s1095_s23 }
 0x121   : > { %v883_v1 = vstv %s1097_s24  ;;  %p1188_p5 = pnand %p1187_p3, %p1181_p0 }
 0x122   : > { %v859_v50 = vadd.f32 %v857_v46, %v838_v43  ;;  %v860_v51 = vadd.f32 %v858_v49, %v839_v44  ;;  %s1099_s25 = spop %1098 }
 0x123   : > { %v892_v22 = vstv %s1099_s25 }
 0x124   : > { %v868_v52 = vrot.slane %v859_v50, 6  ;;  %v869_v53 = vrot.slane %v860_v51, 6  ;;  %v872_v54 = vrot.slane %v859_v50, 2  ;;  %v873_v55 = vrot.slane %v860_v51, 2  ;;  %s1101_s26 = spop %1100 }
 0x125   : > { %v866_v9 = vmul.f32 %v864_v56, %v859_v50  ;;  %v867_v10 = vmul.f32 %v864_v56, %v860_v51  ;;  %v907_v30 = vstv %s1101_s26 }
 0x126   : > { %v870_v57 = vsel %vm666_vm14, %v868_v52, %v869_v53  ;;  %v871_v58 = vsel %vm666_vm14, %v869_v53, %v868_v52  ;;  %v874_v60 = vsel %vm671_vm15, %v872_v54, %v873_v55  ;;  %v875_v63 = vsel %vm671_vm15, %v873_v55, %v872_v54  ;;  %s1103_s27 = spop %1102 }
 0x127   : > { %v876_v0 = vsub.f32 0.0, %v874_v60  ;;  %v877_v2 = vsub.f32 0.0, %v875_v63  ;;  %vm1702_vm14 = vcmp.lt.s32.totalorder %v1392_v19, 4  ;;  %v916_v19 = vstv %s1103_s27 }
 0x128   : > { %vm1703_vm15 = vmmov %vm1702_vm14  ;;  %s1105_s28 = spop %1104 }
 0x129   : > { %v878_v4 = vsel %vm188_vm12, %v871_v58, %v876_v0  ;;  %v879_v7 = vsel %vm1701_vm13, %v870_v57, %v877_v2  ;;  %v927_v38 = vstv %s1105_s28 }
 0x12a   : > { %v885_v11 = vmul.f32 %v883_v1, %v878_v4  ;;  %v886_v12 = vmul.f32 %v883_v1, %v879_v7 }
 0x12c   : > { %v887_v16 = vadd.f32 %v885_v11, %v866_v9  ;;  %v888_v17 = vadd.f32 %v886_v12, %v867_v10 }
 0x12e   : > { %v896_v18 = vrot.slane %v887_v16, 4  ;;  %v897_v20 = vrot.slane %v888_v17, 4  ;;  %v894_v32 = vmul.f32 %v892_v22, %v887_v16  ;;  %v895_v21 = vmul.f32 %v892_v22, %v888_v17 }
 0x130   : > { %v898_v8 = vsel %vm1702_vm14, %v896_v18, %v897_v20  ;;  %v899_v47 = vsel %vm1703_vm15, %v897_v20, %v896_v18 }
 0x131   : > { %v900_v29 = vsub.f32 0.0, %v898_v8  ;;  %v901_v59 = vsub.f32 0.0, %v899_v47 }
 0x133   : > { %v902_v31 = vsel %vm190_vm9, %v899_v47, %v900_v29  ;;  %v903_v26 = vsel %vm191_vm10, %v898_v8, %v901_v59 }
 0x134   : > { %v909_v23 = vmul.f32 %v907_v30, %v902_v31  ;;  %v910_v25 = vmul.f32 %v907_v30, %v903_v26 }
 0x136   : > { %v911_v27 = vadd.f32 %v909_v23, %v894_v32  ;;  %v912_v33 = vadd.f32 %v910_v25, %v895_v21 }
 0x138   : > { %v920_v35 = vsub.f32 0.0, %v912_v33  ;;  %v921_v3 = vsub.f32 0.0, %v911_v27  ;;  %v918_v62 = vmul.f32 %v916_v19, %v911_v27  ;;  %v919_v34 = vmul.f32 %v916_v19, %v912_v33 }
 0x13a   : > { %v922_v36 = vsel %vm192_vm11, %v912_v33, %v920_v35  ;;  %v923_v61 = vsel %vm193_vm0, %v911_v27, %v921_v3 }
 0x13b   : > { %v929_v5 = vmul.f32 %v927_v38, %v922_v36  ;;  %v930_v37 = vmul.f32 %v927_v38, %v923_v61 }
 0x13d   : > { %v931_v39 = vadd.f32 %v929_v5, %v918_v62  ;;  %v932_v40 = vadd.f32 %v930_v37, %v919_v34 }
 0x13f   : > { %v933_v41 = vmul.f32 %v931_v39, %v1595_v14  ;;  %v934_v42 = vmul.f32 %v932_v40, %v1597_v15 }
 0x141   : > { %v935_v6 = vmul.f32 %v933_v41, %v933_v41  ;;  %v936_v43 = vmul.f32 %v934_v42, %v934_v42 }
 0x143   : > { %v937_v44 = vmul.f32 %v935_v6, %v216_v24  ;;  %v938_v46 = vmul.f32 %v936_v43, %v217_v28 }
 0x145   : > { %v939_v49 = vadd.f32 %v938_v46, %v937_v44 }
 0x147   : > { %v940_v50 = vrot.slane %v939_v49, 4 }
 0x149   : > { %v941_v51 = vadd.f32 %v940_v50, %v939_v49 }
 0x14b   : > { %v942_v14 = vrot.slane %v941_v51, 2 }
 0x14d   : > { %v943_v52 = vadd.f32 %v942_v14, %v941_v51 }
 0x14f   : > { %v944_v48 = vrot.slane %v943_v52, 1 }
 0x151   : > { %v945_v15 = vadd.f32 %v944_v48, %v943_v52 }
 0x153   : > { %946 = vst [vmem:[%s160_s3] sm:$0x1] %v945_v15 }
 0x154   : > { %1191 = shalt.err (!%p1188_p5)
}
 0x155   : > { %s1192_s20 = scalar_lea.hbm %s959_s7, 16  ;;  %s1196_s25 = scalar_lea.hbm %s1686_s2, 64 }
 0x156   : > { %p1193_p6 = scmp.ne.s32.totalorder %s959_s7, %s1192_s20  ;;  %p1197_p10 = scmp.lt.s32.totalorder %s959_s7, %s1686_s2 }
 0x157   : > { %p1198_p11 = scmp.lt.s32.totalorder %s1196_s25, %s1192_s20 }
 0x158   : > { %p1194_p7 = pnand %p1193_p6, %p1321_p4 }
 0x159   : > { %p1199_p12 = por %p1198_p11, %p1197_p10 }
 0x15a   : > { %p1195_p9 = pneg %p1194_p7 }
 0x15c   : > { %p1200_p13 = pnand %p1199_p12, %p1195_p9 }
 0x15e   : > { %1203 = shalt.err (!%p1200_p13)
}
 0x15f   : > { %1106 = dma.vmem_to_hbm [thread:$0]  (%p1321_p4), %s962_s4, 16, %s959_s7, %s948_s8  }
 0x160 PF: > { %p1112_p0 = scmp.ge.s32.totalorder %s1254_s14, 2  ;;  %s973_s28 = sand.u32 1, %s1234_s9  }
 0x161   : > { %s974_s29 = scalar_lea.sflag [#allocation3], %s973_s28 }
 0x162   : > { %p1109_p1 = pnand %p1112_p0, %p1328_p8 }
 0x164   : > { %p1110_p2 = pneg %p1109_p1 }
 0x166   : > { %1229 = dma.done.wait (%p1110_p2), %s974_s29, 16  }
 0x167   : > { %1231 = vsyncadd (%p1110_p2), %s974_s29, 4294967280  ;;  %s15_s14 = sadd.s32 1, %s1254_s14   ;;  %s1704_s9 = smov %s1238_s10 }
 0x168   : > { %p12_p3 = scmp.ge.s32.totalorder %s15_s14, 6   ;;  %s1705_s10 = smov %s1242_s11 }
 0x169   : > { %s1706_s11 = smov %s1334_s22  ;;  %s1707_s12 = smov %s1250_s13 }
 0x16a   : > { %s1708_s13 = smov %s1710_s17  ;;  %14 = sbr.rel (!%p12_p3) target bundleno = 4 (0x4), region = 66 }
 0x16f   :  { %978 = vsyncpa [#allocation3], 1 }
 0x170   :  { %980 = vsyncpa [#allocation3 + $0x1], 1 }

</bundles_post_ra>
